<compile_context>
chip_gen: v7x
topology: tpu7x:2x2x1
jax: 0.10.0
libtpu: 0.0.40
codegen_flags: <defaults>
</compile_context>

<pallas_src>
import functools

import jax
import jax.numpy as jnp
from jax.experimental import pallas as pl
from jax.experimental.pallas import tpu as pltpu


def _round_up(x, m):
    return ((x + m - 1) // m) * m


def _row_matmul_kernel(a_ref, b_ref, bias_ref, o_ref, *, apply_relu):
    """One row tile: o = act(a_tile @ b + bias).  a/b are bf16, accumulation is f32."""
    acc = jnp.dot(a_ref[...], b_ref[...], preferred_element_type=jnp.float32)
    acc = acc + bias_ref[...]                       # bias kept in f32
    if apply_relu:
        acc = jnp.maximum(acc, 0.0)
    o_ref[...] = acc.astype(o_ref.dtype)


def row_matmul(a, b, bias, *, apply_relu, out_dtype, tile_rows=512):
    """Row-tiled  act(a @ b + bias)  with b and bias resident in VMEM.

    a:    [M, K]  bf16  -- streamed in (TM, K) row tiles (double-buffered DMA)
    b:    [K, F]  bf16  -- resident, F is a multiple of 128 (lane-dense)
    bias: [1, F]  f32   -- resident
    """
    m, k = a.shape
    k2, f = b.shape
    assert k == k2 and f % 128 == 0

    tm = min(tile_rows, _round_up(m, 8))
    m_pad = _round_up(m, tm)
    if m_pad != m:
        a = jnp.pad(a, ((0, m_pad - m), (0, 0)))

    out = pl.pallas_call(
        functools.partial(_row_matmul_kernel, apply_relu=apply_relu),
        out_shape=jax.ShapeDtypeStruct((m_pad, f), out_dtype),
        grid_spec=pltpu.PrefetchScalarGridSpec(
            num_scalar_prefetch=0,
            grid=(m_pad // tm,),
            in_specs=[
                pl.BlockSpec((tm, k), lambda i: (i, 0)),   # streamed row tile of a
                pl.BlockSpec((k, f), lambda i: (0, 0)),    # resident b
                pl.BlockSpec((1, f), lambda i: (0, 0)),    # resident bias
            ],
            out_specs=pl.BlockSpec((tm, f), lambda i: (i, 0)),
        ),
        compiler_params=pltpu.CompilerParams(
            dimension_semantics=("parallel",),             # megacore sharding on v7x
            vmem_limit_bytes=48 * 1024 * 1024,             # above 16/32 MiB defaults,
        ),                                                 # under v7x's 64 MiB physical
    )(a, b, bias)
    return out[:m]


def gcn_forward(a_hat, x, w1, b1, w2, b2, *, tile_rows=512):
    """2-layer GCN forward (DGL GraphConv semantics; eval-mode dropout = identity)."""
    hid = w1.shape[1]
    out_size = w2.shape[1]
    hid_pad = _round_up(hid, 128)
    out_pad = _round_up(out_size, 128)

    # bf16 MXU operands (f32 accumulation happens inside the kernel).
    a_bf = a_hat.astype(jnp.bfloat16)
    x_bf = x.astype(jnp.bfloat16)
    w1_p = jnp.pad(w1, ((0, 0), (0, hid_pad - hid))).astype(jnp.bfloat16)
    w2_p = jnp.pad(w2, ((0, hid_pad - hid), (0, out_pad - out_size))).astype(jnp.bfloat16)
    b1_p = jnp.pad(b1.reshape(1, -1), ((0, 0), (0, hid_pad - hid))).astype(jnp.float32)
    b2_p = jnp.pad(b2.reshape(1, -1), ((0, 0), (0, out_pad - out_size))).astype(jnp.float32)
    zero_h = jnp.zeros((1, hid_pad), jnp.float32)
    zero_o = jnp.zeros((1, out_pad), jnp.float32)

    # Layer 1:  H1 = relu(A_hat @ (X @ W1) + b1)     (dropout: identity in eval mode)
    xw1 = row_matmul(x_bf, w1_p, zero_h, apply_relu=False,
                     out_dtype=jnp.bfloat16, tile_rows=tile_rows)
    h1 = row_matmul(a_bf, xw1, b1_p, apply_relu=True,
                    out_dtype=jnp.bfloat16, tile_rows=tile_rows)

    # Layer 2:  H2 = A_hat @ (H1 @ W2) + b2          (dropout: identity in eval mode)
    hw2 = row_matmul(h1, w2_p, zero_o, apply_relu=False,
                     out_dtype=jnp.bfloat16, tile_rows=tile_rows)
    h2 = row_matmul(a_bf, hw2, b2_p, apply_relu=False,
                    out_dtype=jnp.float32, tile_rows=tile_rows)

    return h2[:, :out_size]


def normalize_adjacency(adj):
    """DGL GraphConv norm='both': D^{-1/2} A D^{-1/2}.

    Note: degrees are clamped to >= 1 (DGL instead raises on zero-in-degree nodes
    unless allow_zero_in_degree=True).
    """
    deg = jnp.maximum(adj.sum(axis=1), 1.0)
    d_inv_sqrt = jax.lax.rsqrt(deg)
    return adj * d_inv_sqrt[:, None] * d_inv_sqrt[None, :]


if __name__ == "__main__":
    # Small problem consistent with the module: N nodes, in/hid/out feature sizes.
    N, in_size, hid_size, out_size = 64, 32, 32, 16

    key = jax.random.PRNGKey(0)
    k_adj, k_x, k_w1, k_w2 = jax.random.split(key, 4)

    # Random undirected graph (dense adjacency, no self loops), GraphConv-normalized.
    upper = (jax.random.uniform(k_adj, (N, N)) < 0.1).astype(jnp.float32)
    adj = jnp.triu(upper, k=1)
    adj = adj + adj.T
    a_hat = normalize_adjacency(adj)

    # Node features.
    x = jax.random.normal(k_x, (N, in_size), dtype=jnp.float32)

    # Glorot-uniform init (like DGL GraphConv.reset_parameters), zero biases.
    def glorot(k, shape):
        fan_in, fan_out = shape
        limit = jnp.sqrt(6.0 / (fan_in + fan_out))
        return jax.random.uniform(k, shape, jnp.float32, -limit, limit)

    w1 = glorot(k_w1, (in_size, hid_size))
    b1 = jnp.zeros((hid_size,), dtype=jnp.float32)
    w2 = glorot(k_w2, (hid_size, out_size))
    b2 = jnp.zeros((out_size,), dtype=jnp.float32)

    out = gcn_forward(a_hat, x, w1, b1, w2, b2)
    out = jax.block_until_ready(out)

    # Pure-JAX f32 reference (kernel uses bf16 MXU operands -> loose tolerance).
    ref_h = jnp.maximum(a_hat @ (x @ w1) + b1[None, :], 0.0)
    ref = a_hat @ (ref_h @ w2) + b2[None, :]
    assert out.shape == (N, out_size)
    assert jnp.allclose(out, ref, atol=5e-2, rtol=5e-2), (
        float(jnp.max(jnp.abs(out - ref))))

    print("KERNEL_OK")
</pallas_src>

<mosaic_0001>
module attributes {stable_mosaic.version = 11 : i64} {
  func.func @_row_matmul_kernel(%arg0: i32, %arg1: memref<64x32xbf16, #tpu.memory_space<vmem>>, %arg2: memref<32x128xbf16, #tpu.memory_space<vmem>>, %arg3: memref<1x128xf32, #tpu.memory_space<vmem>>, %arg4: memref<64x128xbf16, #tpu.memory_space<vmem>>) attributes {dimension_semantics = [#tpu.dimension_semantics<parallel>], iteration_bounds = array<i64: 1>, scalar_prefetch = 0 : i64, scratch_operands = 0 : i64, tpu.core_type = #tpu.core_type<tc>, window_params = [{transform_indices = @transform_0, window_bounds = array<i64: 64, 32>}, {pipeline_mode = #tpu.pipeline_mode<synchronous>, transform_indices = @transform_1, window_bounds = array<i64: 32, 128>}, {pipeline_mode = #tpu.pipeline_mode<synchronous>, transform_indices = @transform_2, window_bounds = array<i64: 1, 128>}, {transform_indices = @transform_3, window_bounds = array<i64: 64, 128>}]} {
    %c0 = arith.constant 0 : index
    %c0_0 = arith.constant 0 : index
    %0 = vector.load %arg1[%c0, %c0_0] : memref<64x32xbf16, #tpu.memory_space<vmem>>, vector<64x32xbf16>
    %c0_1 = arith.constant 0 : index
    %c0_2 = arith.constant 0 : index
    %1 = vector.load %arg2[%c0_1, %c0_2] : memref<32x128xbf16, #tpu.memory_space<vmem>>, vector<32x128xbf16>
    %cst = arith.constant dense<0.000000e+00> : vector<64x128xf32>
    %2 = tpu.matmul %0, %1, %cst {dimension_numbers = #tpu.dot_dimension_numbers<[1], [0], [0], [1], [0, 0, 1, 1], [], []>} : vector<64x32xbf16>, vector<32x128xbf16>, vector<64x128xf32> -> vector<64x128xf32>
    %c0_3 = arith.constant 0 : index
    %c0_4 = arith.constant 0 : index
    %3 = vector.load %arg3[%c0_3, %c0_4] : memref<1x128xf32, #tpu.memory_space<vmem>>, vector<1x128xf32>
    %4 = vector.broadcast %3 : vector<1x128xf32> to vector<64x128xf32>
    %5 = arith.addf %2, %4 : vector<64x128xf32>
    %6 = arith.truncf %5 : vector<64x128xf32> to vector<64x128xbf16>
    %c0_5 = arith.constant 0 : index
    %c0_6 = arith.constant 0 : index
    %7 = vector.load %arg4[%c0_5, %c0_6] : memref<64x128xbf16, #tpu.memory_space<vmem>>, vector<64x128xbf16>
    tpu.vector_store %arg4[%c0_5, %c0_6], %6 {strides = array<i32>} : memref<64x128xbf16, #tpu.memory_space<vmem>>, vector<64x128xbf16>,
    return
  }
  func.func @transform_0(%arg0: i32) -> (i32, i32) {
    %c0_i32 = arith.constant 0 : i32
    %c0_i32_0 = arith.constant 0 : i32
    return %arg0, %c0_i32 : i32, i32
  }
  func.func @transform_1(%arg0: i32) -> (i32, i32) {
    %c0_i32 = arith.constant 0 : i32
    %c0_i32_0 = arith.constant 0 : i32
    %c0_i32_1 = arith.constant 0 : i32
    return %c0_i32, %c0_i32_0 : i32, i32
  }
  func.func @transform_2(%arg0: i32) -> (i32, i32) {
    %c0_i32 = arith.constant 0 : i32
    %c0_i32_0 = arith.constant 0 : i32
    %c0_i32_1 = arith.constant 0 : i32
    return %c0_i32, %c0_i32_0 : i32, i32
  }
  func.func @transform_3(%arg0: i32) -> (i32, i32) {
    %c0_i32 = arith.constant 0 : i32
    %c0_i32_0 = arith.constant 0 : i32
    return %arg0, %c0_i32 : i32, i32
  }
}

</mosaic_0001>

<bundles_post_ra>
// kernel: tpu_custom_call.1
= control target key start
LH: loop header
LB: loop body
LE: loop exit
PB: predicated region body
PF: predicated region fallthrough
CT: control target
= control target key end

     0   :  { %vm67_vm0 = vcmask 261120   ;;  %s362_s0 = inlined_call_operand.vmem [shape: bf16[64,32], index: 0, kind: input, shape index: {}]   ;;  %s363_s1 = inlined_call_operand.vmem [shape: bf16[32,128], index: 1, kind: input, shape index: {}]   ;;  %s364_s2 = inlined_call_operand.vmem [shape: f32[1,128], index: 2, kind: input, shape index: {}]   ;;  %s365_s3 = inlined_call_operand.hbm [shape: bf16[64,128], index: 3, kind: output, shape index: {}]  }
   0x1   :  { %v276_v0 = vld [vmem:[%s363_s1] sm:$0xff]   ;;  %v277_v1 = vld [vmem:[%s363_s1 + $0x8] sm:$0xff]   ;;  %v279_v3 = vld [vmem:[%s362_s0 + $0x10] sm:$0xff]  }
   0x2   :  { %257 = vmatprep.subr.bf16.mxu0 %v276_v0  ;;  %269 = vmatprep.subr.bf16.mxu1 %v276_v0  ;;  %v278_v2 = vld [vmem:[%s362_s0] sm:$0xff]   ;;  %v280_v4 = vld [vmem:[%s362_s0 + $0x8] sm:$0xff]   ;;  %v281_v5 = vld [vmem:[%s362_s0 + $0x18] sm:$0xff]  }
   0x3   :  { %258 = vmatpush3.bf16.msra.mxu0 %v276_v0  ;;  %271 = vmatpush3.bf16.msra.mxu1 %v276_v0 }
   0x4   :  { %259 = vmatprep.subr.bf16.mxu0 %v277_v1  ;;  %270 = vmatprep.subr.bf16.mxu1 %v277_v1 }
   0x5   :  { %261 = vmatprep.mubr.msk.bf16.mxu0 %vm67_vm0, %v278_v2  ;;  %265 = vmatprep.mubr.msk.bf16.mxu1 %vm67_vm0, %v279_v3 }
   0x6   :  { %8 = vsyncpa [#allocation3], 0  ;;  %v201_v7 = vld [vmem:[%s364_s2] ss:$0 sm:$0xff]  ;;  %s306_s25 = smov [#allocation2]  }
   0x7   :  { %260 = vmatpush3.bf16.msra.mxu0 %v277_v1  ;;  %272 = vmatpush3.bf16.msra.mxu1 %v277_v1  ;;  %s190_s26 = sshll.u32 %s306_s25, 4  ;;  %s191_s26 = int_to_ptr.vmem [resolvable:$true] %s190_s26 }
   0x8   :  { %s282_s0 = scalar_lea.vmem %s191_s26, 512  ;;  %p287_p1 = scmp.lt.s32.totalorder %s191_s26, %s191_s26 }
   0x9   :  { %p283_p0 = scmp.ne.s32.totalorder %s191_s26, %s282_s0  ;;  %p288_p2 = scmp.lt.s32.totalorder %s282_s0, %s282_s0 }
   0xa   :  { %262 = vmatmul.mubr.msk.bf16.vlgmr.msra.gmra.mrb[0].mxu0 %vm67_vm0, %v280_v4  ;;  %266 = vmatmul.mubr.msk.bf16.vlgmr.msra.gmra.mrb[0].mxu1 %vm67_vm0, %v281_v5 }
   0xb   :  { %p289_p3 = por %p288_p2, %p287_p1 }
   0xd   :  { %p290_p4 = pnand %p289_p3, %p283_p0 }
  0xdd   :  { %v263_v6 = vpop.f32.mrb[0].mxu0  ;;  %v267_v8 = vpop.f32.mrb[0].mxu1 }
  0xde   :  { %v114_v9 = vpop.f32.mrb[1].mxu0  ;;  %v130_v10 = vpop.f32.mrb[1].mxu1  ;;  %v123_v13 = vadd.f32 %v263_v6, %v201_v7  ;;  %v139_v14 = vadd.f32 %v267_v8, %v201_v7 }
  0xdf   :  { %v264_v11 = vpop.f32.mrb[2].mxu0  ;;  %v268_v12 = vpop.f32.mrb[2].mxu1  ;;  %v115_v19 = vadd.f32 %v201_v7, %v114_v9  ;;  %v131_v20 = vadd.f32 %v201_v7, %v130_v10 }
  0xe0   :  { %v126_v15 = vadd.f32 %v264_v11, %v201_v7  ;;  %v142_v16 = vadd.f32 %v268_v12, %v201_v7  ;;  %v117_v17 = vpop.f32.mrb[3].mxu0  ;;  %v133_v18 = vpop.f32.mrb[3].mxu1 }
  0xe1   :  { %v118_v21 = vadd.f32 %v201_v7, %v117_v17  ;;  %v134_v22 = vadd.f32 %v201_v7, %v133_v18 }
  0xe2   :  { %v236_v23 = vpack.c.bf16 %v126_v15, %v123_v13  ;;  %v246_v24 = vpack.c.bf16 %v142_v16, %v139_v14 }
  0xe3   :  { %v231_v25 = vpack.c.bf16 %v118_v21, %v115_v19  ;;  %v241_v26 = vpack.c.bf16 %v134_v22, %v131_v20 }
  0xe4   :  { %248 = vst [vmem:[#allocation2 + $0x8] sm:$0xff] %v236_v23   ;;  %250 = vst [vmem:[#allocation2 + $0x18] sm:$0xff] %v246_v24  }
  0xe5   :  { %232 = vst [vmem:[#allocation2] sm:$0xff] %v231_v25   ;;  %249 = vst [vmem:[#allocation2 + $0x10] sm:$0xff] %v241_v26  }
  0xe6   :  { %293 = shalt.err (!%p290_p4)
}
  0xe7   :  { %s294_s28 = scalar_lea.hbm %s365_s3, 512 }
  0xe8   :  { %p295_p5 = scmp.ne.s32.totalorder %s365_s3, %s294_s28  ;;  %p298_p6 = scmp.lt.u32.totalorder %s294_s28, %s365_s3 }
  0xea   :  { %p300_p7 = pnand %p298_p6, %p295_p5 }
  0xec   :  { %303 = shalt.err (!%p300_p7)
}
  0xed   :  { %s307_s6 = smov 64   ;;  %s308_s7 = smov 4  }
  0xee   :  { %196 = dma.vmem_to_hbm [thread:$0]  %s191_s26, 512, %s365_s3, [#allocation3], %s307_s6, %s307_s6, %s308_s7  }
  0xef   :  { %304 = dma.done.wait [#allocation3], 512  }
  0xf0   :  { %305 = vsyncadd [#allocation3], 4294966784 }
  0xf1   :  { %200 = vsyncpa [#allocation3], 1 }

</bundles_post_ra>
